<compile_context>
chip_gen: v7x
topology: tpu7x:2x2x1
jax: 0.10.0
libtpu: 0.0.40
codegen_flags: <defaults>
</compile_context>

<pallas_src>
import math
import types
import functools

import jax
import jax.numpy as jnp
import numpy as np
from jax.experimental import pallas as pl
from jax.experimental.pallas import tpu as pltpu


# ----------------------------------------------------------------------------
# Device / tile sizing helpers
# ----------------------------------------------------------------------------
def _vmem_capacity_bytes():
    try:
        return int(pltpu.get_tpu_info().vmem_capacity_bytes)
    except Exception:
        return 64 * 1024 * 1024      # conservative (v7x per-TensorCore VMEM)


def _round_down8(x):
    return max(8, (x // 8) * 8)


def _select_tm(M, HD, heads, n_base, n_ip, in_itemsize, out_itemsize, acc_itemsize,
               has_base, has_acc, has_mask):
    """Largest query tile whose double-buffered blocks + f32 temps fit the VMEM budget."""
    budget = int(_vmem_capacity_bytes() * 0.55)          # headroom for compiler scratch
    Dh = HD // heads
    fixed = 2 * 2 * n_ip * HD * in_itemsize              # ip k/v blocks, double buffered
    if has_base:
        fixed += 2 * 2 * n_base * HD * in_itemsize       # base k/v blocks
    per_row = 2 * HD * in_itemsize + 2 * HD * out_itemsize   # q + out blocks (x2 buffers)
    if has_acc:
        per_row += 2 * HD * acc_itemsize
    if has_mask:
        per_row += 2 * 4
    # f32 temporaries live inside one unrolled head: score rows + partial outputs.
    per_row += 4 * ((n_base if has_base else 0) + n_ip + 4 * Dh)
    tm = _round_down8(min(1024, max(8, (budget - fixed) // max(per_row, 1))))
    if M <= tm:
        return M, fixed + M * per_row
    for cand in range(tm, 7, -8):                        # prefer a divisor of M
        if M % cand == 0:
            return cand, fixed + cand * per_row
    return tm, fixed + tm * per_row


# ----------------------------------------------------------------------------
# Fused attention kernel (BM(HK) layout, base + IP + acc + mask in one pass)
# ----------------------------------------------------------------------------
def _attn_kernel(idx_ref, q_ref, *refs, heads, scale, ip_weight,
                 has_base, has_ip, has_acc, has_mask):
    del idx_ref                        # only consumed by the BlockSpec index_maps
    refs = list(refs)
    k_ref = v_ref = ipk_ref = ipv_ref = acc_ref = mask_ref = None
    if has_base:
        k_ref = refs.pop(0)
        v_ref = refs.pop(0)
    if has_ip:
        ipk_ref = refs.pop(0)
        ipv_ref = refs.pop(0)
    if has_acc:
        acc_ref = refs.pop(0)
    if has_mask:
        mask_ref = refs.pop(0)
    (o_ref,) = refs

    HD = q_ref.shape[-1]
    Dh = HD // heads
    mask_col = mask_ref[0].astype(jnp.float32) if has_mask else None   # [TM, 1]

    def head_attn(q_h, kk_ref, vv_ref, lo):
        k_h = kk_ref[0, :, lo:lo + Dh]                                  # [N, Dh]
        v_h = vv_ref[0, :, lo:lo + Dh]
        s = jax.lax.dot_general(q_h, k_h, (((1,), (1,)), ((), ())),
                                preferred_element_type=jnp.float32)     # [TM, N] f32
        m = jnp.max(s, axis=-1, keepdims=True)
        p = jnp.exp(s - m)
        l = jnp.sum(p, axis=-1, keepdims=True)
        o = jnp.dot(p.astype(v_h.dtype), v_h, preferred_element_type=jnp.float32)
        return o, pl.reciprocal(l, approx=False)        # EXACT 1/l for reference parity

    for h in range(heads):                              # unrolled at trace time
        lo = h * Dh
        q_h = q_ref[0, :, lo:lo + Dh] * scale           # scale folded into q (M*Dh mul)
        res = None
        if has_ip:
            o_ip, inv_ip = head_attn(q_h, ipk_ref, ipv_ref, lo)
            if ip_weight != 1.0:                        # fold 'V only' weight into 1/l
                inv_ip = inv_ip * ip_weight
            if has_mask:                                # fold mask into the [TM,1] factor
                inv_ip = inv_ip * mask_col
            res = o_ip * inv_ip
        if has_base:
            o_b, inv_b = head_attn(q_h, k_ref, v_ref, lo)
            o_b = o_b * inv_b
            res = o_b if res is None else res + o_b
        if has_acc:
            res = res + acc_ref[0, :, lo:lo + Dh].astype(jnp.float32)
        o_ref[0, :, lo:lo + Dh] = res.astype(o_ref.dtype)   # per-head lane-slice store


def pallas_attention(q, heads, *, k=None, v=None, ip_k=None, ip_v=None,
                     kv_index=None, ip_weight=1.0, acc=None, mask=None,
                     out_dtype=None):
    """out = [acc] + [attn(q, k, v)] + [mask *] ip_weight * attn(q, ip_k[kv_index], ip_v[kv_index])
    in one fused Pallas kernel (BM(HK) layout).  All bracketed terms are optional;
    `kv_index` broadcasts a compact ip kv tensor per batch element without
    materializing tiled copies."""
    B, M, HD = q.shape
    assert HD % heads == 0
    has_base = k is not None
    has_ip = ip_k is not None
    assert has_base or has_ip
    assert mask is None or has_ip
    Dh = HD // heads
    scale = 1.0 / math.sqrt(Dh)
    out_dtype = out_dtype or q.dtype

    n_base = k.shape[1] if has_base else 0
    n_ip = ip_k.shape[1] if has_ip else 0

    TM, est_bytes = _select_tm(
        M, HD, heads, n_base, n_ip,
        jnp.dtype(q.dtype).itemsize, jnp.dtype(out_dtype).itemsize,
        jnp.dtype(acc.dtype).itemsize if acc is not None else 0,
        has_base, acc is not None, mask is not None)
    grid = (B, pl.cdiv(M, TM))

    if kv_index is None:
        kv_index = jnp.arange(B, dtype=jnp.int32)
    kv_index = jnp.asarray(kv_index, dtype=jnp.int32)

    in_specs = [pl.BlockSpec((1, TM, HD), lambda b, mt, idx: (b, mt, 0))]     # q
    args = [q]
    if has_base:
        in_specs += [pl.BlockSpec((1, n_base, HD), lambda b, mt, idx: (b, 0, 0)),
                     pl.BlockSpec((1, n_base, HD), lambda b, mt, idx: (b, 0, 0))]
        args += [k, v]
    if has_ip:
        in_specs += [pl.BlockSpec((1, n_ip, HD), lambda b, mt, idx: (idx[b], 0, 0)),
                     pl.BlockSpec((1, n_ip, HD), lambda b, mt, idx: (idx[b], 0, 0))]
        args += [ip_k, ip_v]
    if acc is not None:
        in_specs.append(pl.BlockSpec((1, TM, HD), lambda b, mt, idx: (b, mt, 0)))
        args.append(acc)
    if mask is not None:
        in_specs.append(pl.BlockSpec((1, TM, 1), lambda b, mt, idx: (b, mt, 0)))
        args.append(mask.astype(jnp.float32))

    vmem_cap = _vmem_capacity_bytes()
    vmem_limit = int(min(vmem_cap, max(32 * 1024 * 1024, est_bytes * 2)))

    kernel = functools.partial(
        _attn_kernel, heads=heads, scale=scale, ip_weight=float(ip_weight),
        has_base=has_base, has_ip=has_ip, has_acc=acc is not None,
        has_mask=mask is not None)

    return pl.pallas_call(
        kernel,
        out_shape=jax.ShapeDtypeStruct((B, M, HD), out_dtype),
        grid_spec=pltpu.PrefetchScalarGridSpec(
            num_scalar_prefetch=1,
            grid=grid,
            in_specs=in_specs,
            out_specs=pl.BlockSpec((1, TM, HD), lambda b, mt, idx: (b, mt, 0)),
        ),
        compiler_params=pltpu.CompilerParams(
            dimension_semantics=("parallel", "parallel"),
            vmem_limit_bytes=vmem_limit,
        ),
    )(kv_index, *args)


# ----------------------------------------------------------------------------
# Pallas matmul (ip-adapter to_k_ip / to_v_ip projections)
# ----------------------------------------------------------------------------
def _matmul_kernel(x_ref, w_ref, o_ref):
    o_ref[...] = jnp.dot(x_ref[...], w_ref[...],
                         preferred_element_type=jnp.float32).astype(o_ref.dtype)


def _tile_dim(n, cap, quantum):
    if n <= cap:
        return n
    for cand in range(cap - cap % quantum, quantum - 1, -quantum):
        if n % cand == 0:
            return cand
    return cap - cap % quantum


def pallas_matmul(x, w):
    """x: [R, C] @ w: [C, D]; operands stay native dtype, f32 accumulation.
    The output dim is tiled so the resident weight block fits v7x scoped VMEM."""
    R, C = x.shape
    D = w.shape[1]
    TR = _tile_dim(R, 256, 8)
    TD = _tile_dim(D, 1024, 128)
    return pl.pallas_call(
        _matmul_kernel,
        out_shape=jax.ShapeDtypeStruct((R, D), x.dtype),
        grid=(pl.cdiv(R, TR), pl.cdiv(D, TD)),
        in_specs=[pl.BlockSpec((TR, C), lambda r, d: (r, 0)),
                  pl.BlockSpec((C, TD), lambda r, d: (0, d))],
        out_specs=pl.BlockSpec((TR, TD), lambda r, d: (r, d)),
        compiler_params=pltpu.CompilerParams(
            dimension_semantics=("parallel", "parallel")),
    )(x, w)


def pallas_linear(x, w):
    """Bias-free nn.Linear (ip_layers.to_kvs['*_to_k_ip'/'*_to_v_ip']).
    x: [N, T, C], w: [C, D] (torch weight [D, C] stored transposed)."""
    Nb, T, C = x.shape
    return pallas_matmul(x.reshape(Nb * T, C), w).reshape(Nb, T, w.shape[1])


def project_ip_kv(ipadapter, k_key, v_key, cond, uncond):
    """Project cond/uncond through to_k_ip / to_v_ip.  Returns the COMPACT
    (un-tiled) ip_k / ip_v of shape [Nc+Nu, T, HD] (cond rows first) and (Nc, Nu).
    If raw weights are available, all four projections run as one fused Pallas
    matmul; the concatenated weight is cached on the adapter across calls."""
    raw = getattr(getattr(ipadapter, "ip_layers", None), "weights", None)
    if raw is not None and k_key in raw and v_key in raw:
        w_k, w_v = raw[k_key], raw[v_key]
        cache = getattr(ipadapter, "_fused_w_cache", None)
        if cache is None:
            cache = {}
            try:
                ipadapter._fused_w_cache = cache
            except Exception:
                pass
        w_kv = cache.get((k_key, v_key))
        if w_kv is None:
            w_kv = jnp.concatenate([w_k, w_v], axis=1)
            cache[(k_key, v_key)] = w_kv
        Nc, T, C = cond.shape
        Nu = uncond.shape[0]
        HD = w_k.shape[1]
        x = jnp.concatenate([cond, uncond], axis=0).reshape((Nc + Nu) * T, C)
        y = pallas_matmul(x, w_kv).reshape(Nc + Nu, T, 2 * HD)
        return y[..., :HD], y[..., HD:], Nc, Nu
    k_c = ipadapter.ip_layers.to_kvs[k_key](cond)
    k_u = ipadapter.ip_layers.to_kvs[k_key](uncond)
    v_c = ipadapter.ip_layers.to_kvs[v_key](cond)
    v_u = ipadapter.ip_layers.to_kvs[v_key](uncond)
    return (jnp.concatenate([k_c, k_u], axis=0),
            jnp.concatenate([v_c, v_u], axis=0), k_c.shape[0], k_u.shape[0])


# ----------------------------------------------------------------------------
# Host-side glue (pure JAX / Python)
# ----------------------------------------------------------------------------
def tensor_to_size(source, dest_size):
    if hasattr(dest_size, "shape"):
        dest_size = dest_size.shape[0]
    source_size = source.shape[0]
    if source_size < dest_size:
        reps = [dest_size - source_size] + [1] * (source.ndim - 1)
        source = jnp.concatenate([source, jnp.tile(source[-1:], reps)], axis=0)
    elif source_size > dest_size:
        source = source[:dest_size]
    return source


def prepare_ip_mask(mask, oh, ow, seq_len, batch_prompt, cond_or_uncond, ad_params):
    """Resize / tile / pad the IP-Adapter attention mask like the torch reference
    (F.interpolate bilinear -> repeat -> center pad/crop) but kept compact as
    [B, seq_len, 1] (broadcast over HD inside the kernel epilogue)."""
    # TODO(synk): jax.image.resize(bilinear) stands in for torch F.interpolate(align_corners=False).
    mask = jnp.asarray(mask, dtype=jnp.float32)
    mask_h = oh / math.sqrt(oh * ow / seq_len)
    mask_h = int(mask_h) + int(seq_len % int(mask_h) != 0)
    mask_w = seq_len // mask_h
    if mask.shape[0] > 1 and ad_params is not None and ad_params['sub_idxs'] is not None:
        if mask.shape[0] >= ad_params['full_length']:
            mask = mask[jnp.asarray(ad_params['sub_idxs'])]
            mask = jax.image.resize(mask, (mask.shape[0], mask_h, mask_w), method='bilinear')
        else:
            mask = jax.image.resize(mask, (mask.shape[0], mask_h, mask_w), method='bilinear')
            mask = tensor_to_size(mask, ad_params['full_length'])
            mask = mask[jnp.asarray(ad_params['sub_idxs'])]
    else:
        mask = jax.image.resize(mask, (mask.shape[0], mask_h, mask_w), method='bilinear')
        mask = tensor_to_size(mask, batch_prompt)
    mask = jnp.tile(mask, (len(cond_or_uncond), 1, 1))
    mask = mask.reshape(mask.shape[0], -1)
    mask_len = mask_h * mask_w
    if mask_len < seq_len:
        pad_len = seq_len - mask_len
        pad1 = pad_len // 2
        pad2 = pad_len - pad1
        mask = jnp.pad(mask, ((0, 0), (pad1, pad2)), constant_values=0.0)
    elif mask_len > seq_len:
        crop_start = (mask_len - seq_len) // 2
        mask = mask[:, crop_start:crop_start + seq_len]
    return mask[..., None]                      # [B, seq_len, 1]


class IPAdapterStub:
    """Minimal IPAdapter stand-in: ip_layers.to_kvs maps '<n>_to_k_ip'/'<n>_to_v_ip'
    to bias-free linear projections.  Raw weights are also exposed so the forward
    pass can fuse the four projections into a single Pallas matmul."""

    def __init__(self, proj_weights):
        self.weights = dict(proj_weights)
        to_kvs = {name: functools.partial(pallas_linear, w=w)
                  for name, w in proj_weights.items()}
        self.ip_layers = types.SimpleNamespace(to_kvs=to_kvs, weights=self.weights)
        self._fused_w_cache = {}


class CrossAttentionPatch:
    def __init__(self, ipadapter=None, number=0, weight=1.0, cond=None,
                 cond_alt=None, uncond=None, weight_type='linear', mask=None,
                 sigma_start=0.0, sigma_end=1.0, unfold_batch=False,
                 embeds_scaling='V only'):
        self.weights = [weight if isinstance(weight, dict) else float(weight)]
        self.ipadapters = [ipadapter]
        self.conds = [cond]
        self.conds_alt = [cond_alt]
        self.unconds = [uncond]
        self.weight_types = [weight_type]
        self.masks = [mask]
        self.sigma_starts = [sigma_start]
        self.sigma_ends = [sigma_end]
        self.unfold_batch = [unfold_batch]
        self.embeds_scaling = [embeds_scaling]
        self.number = number
        self.layers = 11 if '101_to_k_ip' in ipadapter.ip_layers.to_kvs else 16
        self.k_key = str(self.number * 2 + 1) + '_to_k_ip'
        self.v_key = str(self.number * 2 + 1) + '_to_v_ip'
        self.forward_patch_key = id(self)
        self.optimized_attention = pallas_attention
        self.cache_map = {}
        self._bind_model = None
        self._use_crossAttention_patch = True

    def set_new_condition(self, ipadapter=None, number=0, weight=1.0, cond=None,
                          cond_alt=None, uncond=None, weight_type='linear',
                          mask=None, sigma_start=0.0, sigma_end=1.0,
                          unfold_batch=False, embeds_scaling='V only'):
        self.weights.append(weight if isinstance(weight, dict) else float(weight))
        self.ipadapters.append(ipadapter)
        self.conds.append(cond)
        self.conds_alt.append(cond_alt)
        self.unconds.append(uncond)
        self.weight_types.append(weight_type)
        self.masks.append(mask)
        self.sigma_starts.append(sigma_start)
        self.sigma_ends.append(sigma_end)
        self.unfold_batch.append(unfold_batch)
        self.embeds_scaling.append(embeds_scaling)

    def set_cache(self, key, value):
        self.cache_map[key] = value

    def retrieve_from_cache(self, key, default=None):
        return self.cache_map.get(key, default)

    def _kv_index(self, cond_or_uncond, batch_prompt, nc, nu, b):
        cache_key = ('kv_idx', tuple(cond_or_uncond), batch_prompt, nc, nu, b)
        kv_idx = self.cache_map.get(cache_key)
        if kv_idx is None:
            part_off = (0, nc)
            part_len = (nc, nu)
            kv_idx = jnp.asarray(
                [part_off[cond_or_uncond[i // batch_prompt]]
                 + (i % batch_prompt) % part_len[cond_or_uncond[i // batch_prompt]]
                 for i in range(b)], dtype=jnp.int32)
            self.cache_map[cache_key] = kv_idx
        return kv_idx

    def forward(self, q, k, v, extra_options):
        dtype = q.dtype
        cond_or_uncond = extra_options['cond_or_uncond']
        sigma = extra_options['sigmas'] if 'sigmas' in extra_options else 999999999.9
        if hasattr(sigma, 'ndim') and getattr(sigma, 'ndim', 0) > 0:
            # TODO(synk): a traced sigma would need lax.cond gating instead of this Python branch.
            sigma = float(np.asarray(sigma).reshape(-1)[0])
        else:
            sigma = float(sigma)
        block_type = extra_options['block'][0]
        t_idx = extra_options['transformer_index']
        self_masks = extra_options.get('_masks', {}).get(self.forward_patch_key, self.masks)
        ad_params = extra_options['ad_params'] if 'ad_params' in extra_options else None
        b = q.shape[0]
        seq_len = q.shape[1]
        batch_prompt = b // len(cond_or_uncond)
        heads = extra_options['n_heads']
        _, _, oh, ow = extra_options['original_shape']

        # `out` stays None until the first active adapter so the base attention is
        # computed inside that adapter's fused kernel; accumulation stays f32.
        out = None

        for (weight, cond, cond_alt, uncond, ipadapter, mask, weight_type,
             sigma_start, sigma_end, unfold_batch, embeds_scaling) in zip(
                self.weights, self.conds, self.conds_alt, self.unconds,
                self.ipadapters, self_masks, self.weight_types,
                self.sigma_starts, self.sigma_ends, self.unfold_batch,
                self.embeds_scaling):
            if not (sigma <= sigma_start and sigma >= sigma_end):
                continue

            if weight_type == 'ease in':
                weight = weight * (0.05 + 0.95 * (1 - t_idx / self.layers))
            elif weight_type == 'ease out':
                weight = weight * (0.05 + 0.95 * (t_idx / self.layers))
            elif weight_type == 'ease in-out':
                weight = weight * (0.05 + 0.95 * (1 - abs(t_idx - self.layers / 2) / (self.layers / 2)))
            elif weight_type == 'reverse in-out':
                weight = weight * (0.05 + 0.95 * (abs(t_idx - self.layers / 2) / (self.layers / 2)))
            elif weight_type == 'weak input' and block_type == 'input':
                weight = weight * 0.2
            elif weight_type == 'weak middle' and block_type == 'middle':
                weight = weight * 0.2
            elif weight_type == 'weak output' and block_type == 'output':
                weight = weight * 0.2
            elif weight_type == 'strong middle' and (block_type == 'input' or block_type == 'output'):
                weight = weight * 0.2
            elif isinstance(weight, dict):
                if t_idx not in weight:
                    continue
                weight = weight[t_idx]
                if cond_alt is not None and t_idx in cond_alt:
                    cond = cond_alt[t_idx]

            if unfold_batch and cond.shape[0] > 1:
                if ad_params is not None and ad_params['sub_idxs'] is not None:
                    if cond.shape[0] >= ad_params['full_length']:
                        cond = cond[jnp.asarray(ad_params['sub_idxs'])]
                        uncond = uncond[jnp.asarray(ad_params['sub_idxs'])]
                    else:
                        cond = tensor_to_size(cond, ad_params['full_length'])
                        uncond = tensor_to_size(uncond, ad_params['full_length'])
                        cond = cond[jnp.asarray(ad_params['sub_idxs'])]
                        uncond = uncond[jnp.asarray(ad_params['sub_idxs'])]
                cond = tensor_to_size(cond, batch_prompt)
                uncond = tensor_to_size(uncond, batch_prompt)

            # Compact projections; the kernel broadcasts them per batch via kv_idx.
            ip_k, ip_v, nc, nu = project_ip_kv(ipadapter, self.k_key, self.v_key, cond, uncond)
            kv_idx = self._kv_index(cond_or_uncond, batch_prompt, nc, nu, b)

            out_weight = 1.0
            if embeds_scaling == 'K+mean(V) w/ C penalty':
                scaling = float(ip_k.shape[2]) / 1280.0
                weight = weight * scaling
                ip_k = ip_k * weight
                ip_v_mean = jnp.mean(ip_v, axis=1, keepdims=True)
                ip_v = ip_v - ip_v_mean + ip_v_mean * weight
            elif embeds_scaling == 'K+V w/ C penalty':
                scaling = float(ip_k.shape[2]) / 1280.0
                weight = weight * scaling
                ip_k = ip_k * weight
                ip_v = ip_v * weight
            elif embeds_scaling == 'K+V':
                ip_k = ip_k * weight
                ip_v = ip_v * weight
            else:
                # 'V only': out_ip = attention(...) * weight, folded into the kernel's 1/l factor.
                out_weight = float(weight)

            ip_mask = None
            if mask is not None:
                ip_mask = prepare_ip_mask(mask, oh, ow, seq_len, batch_prompt,
                                          cond_or_uncond, ad_params)

            # One fused kernel per adapter:
            #   first active adapter:  out = attn(q,k,v) + [mask*] w*attn(q,ip_k,ip_v)
            #   later adapters:        out = acc         + [mask*] w*attn(q,ip_k,ip_v)
            out = self.optimized_attention(
                q, heads,
                k=None if out is not None else k,
                v=None if out is not None else v,
                ip_k=ip_k, ip_v=ip_v, kv_index=kv_idx, ip_weight=out_weight,
                acc=out, mask=ip_mask, out_dtype=jnp.float32)

        if out is None:
            out = self.optimized_attention(q, heads, k=k, v=v, out_dtype=jnp.float32)
        return out.astype(dtype)


# ----------------------------------------------------------------------------
# Pure-JAX reference attention (sanity check only)
# ----------------------------------------------------------------------------
def _ref_attention(q, k, v, heads):
    B, M, HD = q.shape
    Dh = HD // heads
    N = k.shape[1]
    qh = q.reshape(B, M, heads, Dh).transpose(0, 2, 1, 3)
    kh = k.reshape(B, N, heads, Dh).transpose(0, 2, 1, 3)
    vh = v.reshape(B, N, heads, Dh).transpose(0, 2, 1, 3)
    s = jnp.einsum('bhmd,bhnd->bhmn', qh, kh) / math.sqrt(Dh)
    p = jax.nn.softmax(s, axis=-1)
    o = jnp.einsum('bhmn,bhnd->bhmd', p, vh)
    return o.transpose(0, 2, 1, 3).reshape(B, M, HD)


if __name__ == "__main__":
    key = jax.random.PRNGKey(0)
    keys = jax.random.split(key, 10)

    B, heads, Dh, M, N = 2, 2, 64, 16, 8      # b=2 (cond + uncond), seq_len=16
    HD = heads * Dh                           # inner attention dim = 128 (lane-dense)
    T_ip, C_ip = 8, 64                        # ip-adapter tokens / embed dim
    w1 = 0.8                                  # adapter 1 weight ('V only')
    w2 = 0.5                                  # adapter 2 weight ('K+V', masked)

    q = jax.random.normal(keys[0], (B, M, HD), dtype=jnp.float32)
    k = jax.random.normal(keys[1], (B, N, HD), dtype=jnp.float32)
    v = jax.random.normal(keys[2], (B, N, HD), dtype=jnp.float32)

    cond1 = jax.random.normal(keys[3], (1, T_ip, C_ip), dtype=jnp.float32)
    uncond1 = jax.random.normal(keys[4], (1, T_ip, C_ip), dtype=jnp.float32)
    cond2 = jax.random.normal(keys[5], (1, T_ip, C_ip), dtype=jnp.float32)
    uncond2 = jax.random.normal(keys[6], (1, T_ip, C_ip), dtype=jnp.float32)

    wk1 = jax.random.normal(keys[7], (C_ip, HD), dtype=jnp.float32) * 0.05
    wv1 = jax.random.normal(keys[8], (C_ip, HD), dtype=jnp.float32) * 0.05
    k9a, k9b, k9c = jax.random.split(keys[9], 3)
    wk2 = jax.random.normal(k9a, (C_ip, HD), dtype=jnp.float32) * 0.05
    wv2 = jax.random.normal(k9b, (C_ip, HD), dtype=jnp.float32) * 0.05
    raw_mask = jax.nn.sigmoid(jax.random.normal(k9c, (1, 8, 8), dtype=jnp.float32))

    ipadapter1 = IPAdapterStub({'1_to_k_ip': wk1, '1_to_v_ip': wv1})
    ipadapter2 = IPAdapterStub({'1_to_k_ip': wk2, '1_to_v_ip': wv2})

    patch = CrossAttentionPatch(
        ipadapter=ipadapter1, number=0, weight=w1, cond=cond1, uncond=uncond1,
        weight_type='linear', sigma_start=999999999.9, sigma_end=0.0,
        embeds_scaling='V only')
    patch.set_new_condition(
        ipadapter=ipadapter2, number=0, weight=w2, cond=cond2, uncond=uncond2,
        weight_type='linear', mask=raw_mask, sigma_start=999999999.9, sigma_end=0.0,
        embeds_scaling='K+V')

    extra_options = {
        'cond_or_uncond': [0, 1],
        'sigmas': 5.0,
        'block': ('input', 1),
        'transformer_index': 1,
        '_masks': {},
        'n_heads': heads,
        'original_shape': [B, 4, 32, 32],
    }

    out = patch.forward(q, k, v, extra_options)
    out = jax.block_until_ready(out)

    # reference: base + w1 * ip1 + mask * ip2 (adapter 2 scales k/v by w2)
    ip_k1 = jnp.concatenate([cond1 @ wk1, uncond1 @ wk1], axis=0)
    ip_v1 = jnp.concatenate([cond1 @ wv1, uncond1 @ wv1], axis=0)
    ip_k2 = jnp.concatenate([cond2 @ wk2, uncond2 @ wk2], axis=0) * w2
    ip_v2 = jnp.concatenate([cond2 @ wv2, uncond2 @ wv2], axis=0) * w2
    mask_proc = prepare_ip_mask(raw_mask, 32, 32, M, 1, [0, 1], None)   # [2, M, 1]
    ref = (_ref_attention(q, k, v, heads)
           + w1 * _ref_attention(q, ip_k1, ip_v1, heads)
           + mask_proc * _ref_attention(q, ip_k2, ip_v2, heads))
    np.testing.assert_allclose(np.asarray(out), np.asarray(ref), rtol=2e-3, atol=2e-3)

    print("KERNEL_OK")
</pallas_src>

<mosaic_0001>
module attributes {stable_mosaic.version = 11 : i64} {
  func.func @_matmul_kernel(%arg0: i32, %arg1: i32, %arg2: memref<16x64xf32, #tpu.memory_space<vmem>>, %arg3: memref<64x256xf32, #tpu.memory_space<vmem>>, %arg4: memref<16x256xf32, #tpu.memory_space<vmem>>) attributes {dimension_semantics = [#tpu.dimension_semantics<parallel>, #tpu.dimension_semantics<parallel>], iteration_bounds = array<i64: 1, 1>, scalar_prefetch = 0 : i64, scratch_operands = 0 : i64, tpu.core_type = #tpu.core_type<tc>, window_params = [{transform_indices = @transform_0, window_bounds = array<i64: 16, 64>}, {transform_indices = @transform_1, window_bounds = array<i64: 64, 256>}, {transform_indices = @transform_2, window_bounds = array<i64: 16, 256>}]} {
    %c0 = arith.constant 0 : index
    %c0_0 = arith.constant 0 : index
    %0 = vector.load %arg2[%c0, %c0_0] : memref<16x64xf32, #tpu.memory_space<vmem>>, vector<16x64xf32>
    %c0_1 = arith.constant 0 : index
    %c0_2 = arith.constant 0 : index
    %1 = vector.load %arg3[%c0_1, %c0_2] : memref<64x256xf32, #tpu.memory_space<vmem>>, vector<64x256xf32>
    %cst = arith.constant dense<0.000000e+00> : vector<16x256xf32>
    %2 = tpu.matmul %0, %1, %cst {dimension_numbers = #tpu.dot_dimension_numbers<[1], [0], [0], [1], [0, 0, 1, 1], [], []>} : vector<16x64xf32>, vector<64x256xf32>, vector<16x256xf32> -> vector<16x256xf32>
    %c0_3 = arith.constant 0 : index
    %c0_4 = arith.constant 0 : index
    %3 = vector.load %arg4[%c0_3, %c0_4] : memref<16x256xf32, #tpu.memory_space<vmem>>, vector<16x256xf32>
    tpu.vector_store %arg4[%c0_3, %c0_4], %2 {strides = array<i32>} : memref<16x256xf32, #tpu.memory_space<vmem>>, vector<16x256xf32>,
    return
  }
  func.func @transform_0(%arg0: i32, %arg1: i32) -> (i32, i32) {
    %c0_i32 = arith.constant 0 : i32
    %c0_i32_0 = arith.constant 0 : i32
    return %arg0, %c0_i32 : i32, i32
  }
  func.func @transform_1(%arg0: i32, %arg1: i32) -> (i32, i32) {
    %c0_i32 = arith.constant 0 : i32
    %c0_i32_0 = arith.constant 0 : i32
    return %c0_i32, %arg1 : i32, i32
  }
  func.func @transform_2(%arg0: i32, %arg1: i32) -> (i32, i32) {
    %c0_i32 = arith.constant 0 : i32
    return %arg0, %arg1 : i32, i32
  }
}

</mosaic_0001>

<bundles_post_ra>
// kernel: tpu_custom_call.1
= control target key start
LH: loop header
LB: loop body
LE: loop exit
PB: predicated region body
PF: predicated region fallthrough
CT: control target
= control target key end

     0   :  { %7 = vsyncpa [#allocation3], 0  ;;  %s335_s0 = inlined_call_operand.hbm [shape: f32[16,64], index: 0, kind: input, shape index: {}]   ;;  %s336_s1 = inlined_call_operand.hbm [shape: f32[64,256], index: 1, kind: input, shape index: {}]   ;;  %s337_s2 = inlined_call_operand.hbm [shape: f32[16,256], index: 2, kind: output, shape index: {}]  }
   0x1   :  { %8 = vsyncpa [#allocation6], 0 }
   0x2   :  { %9 = vsyncpa [#allocation4], 0  ;;  %s270_s9 = smov [#allocation2]   ;;  %s198_s13 = scalar_lea.hbm %s335_s0, 256 }
   0x3   :  { %s15_s10 = sshll.u32 %s270_s9, 4  ;;  %p199_p0 = scmp.ne.s32.totalorder %s335_s0, %s198_s13  ;;  %s16_s10 = int_to_ptr.vmem [resolvable:$true] %s15_s10 }
   0x4   :  { %p202_p1 = scmp.lt.u32.totalorder %s198_s13, %s335_s0 }
   0x6   :  { %p204_p2 = pnand %p202_p1, %p199_p0 }
   0x8   :  { %207 = shalt.err (!%p204_p2)
}
   0x9   :  { %s208_s18 = scalar_lea.vmem %s16_s10, 256  ;;  %p213_p4 = scmp.lt.s32.totalorder %s16_s10, %s16_s10 }
   0xa   :  { %p209_p3 = scmp.ne.s32.totalorder %s16_s10, %s208_s18  ;;  %p214_p5 = scmp.lt.s32.totalorder %s208_s18, %s208_s18 }
   0xc   :  { %p215_p6 = por %p214_p5, %p213_p4 }
   0xe   :  { %p216_p7 = pnand %p215_p6, %p209_p3 }
  0x10   :  { %219 = shalt.err (!%p216_p7)
}
  0x11   :  { %s271_s19 = smov 128   ;;  %s272_s20 = smov 8  }
  0x12   :  { %21 = dma.hbm_to_vmem [thread:$0]  %s335_s0, 256, %s16_s10, [#allocation3], %s271_s19, %s271_s19, %s272_s20  }
  0x13   :  { %s273_s23 = smov [#allocation5]   ;;  %s220_s27 = scalar_lea.hbm %s336_s1, 2048 }
  0x14   :  { %s27_s24 = sshll.u32 %s273_s23, 4  ;;  %p221_p8 = scmp.ne.s32.totalorder %s336_s1, %s220_s27  ;;  %s28_s24 = int_to_ptr.vmem [resolvable:$true] %s27_s24 }
  0x15   :  { %p224_p9 = scmp.lt.u32.totalorder %s220_s27, %s336_s1 }
  0x17   :  { %p226_p10 = pnand %p224_p9, %p221_p8 }
  0x19   :  { %229 = shalt.err (!%p226_p10)
}
  0x1a   :  { %s230_s4 = scalar_lea.vmem %s28_s24, 2048  ;;  %p235_p12 = scmp.lt.s32.totalorder %s28_s24, %s28_s24 }
  0x1b   :  { %p231_p11 = scmp.ne.s32.totalorder %s28_s24, %s230_s4  ;;  %p236_p13 = scmp.lt.s32.totalorder %s230_s4, %s230_s4 }
  0x1d   :  { %p237_p0 = por %p236_p13, %p235_p12 }
  0x1f   :  { %p238_p1 = pnand %p237_p0, %p231_p11 }
  0x21   :  { %241 = shalt.err (!%p238_p1)
}
  0x22   :  { %s274_s0 = smov 256   ;;  %s275_s5 = smov 16  }
  0x23   :  { %33 = dma.hbm_to_vmem [thread:$0]  %s336_s1, 2048, %s28_s24, [#allocation6], %s274_s0, %s274_s0, %s275_s5  }
  0x24   :  { %264 = dma.done.wait [#allocation3], 256  }
  0x25   :  { %265 = vsyncadd [#allocation3], 4294967040 }
  0x26   :  { %266 = dma.done.wait [#allocation6], 2048  }
  0x27   :  { %267 = vsyncadd [#allocation6], 4294965248  ;;  %v276_v0 = vmov 0.0   ;;  %v43_v1 = vld [vmem:[#allocation5 + $0x8] sm:$0xff]  ;;  %v45_v2 = vld [vmem:[#allocation5 + $0x18] sm:$0xff]  ;;  %vm58_vm0 = vcmask 523264  }
  0x28   :  { %129 = vmatprep.mubr.f32.mxu0 %v276_v0  ;;  %135 = vmatprep.mubr.f32.mxu1 %v276_v0  ;;  %v42_v3 = vld [vmem:[#allocation5] sm:$0xff]  ;;  %v166_v4 = vpack.c.bf16 %v45_v2, %v43_v1  ;;  %v44_v5 = vld [vmem:[#allocation5 + $0x10] sm:$0xff]  ;;  %v47_v6 = vld [vmem:[#allocation5 + $0x28] sm:$0xff]  ;;  %s277_s1 = smov [#allocation7]  }
  0x29   :  { %v49_v7 = vld [vmem:[#allocation5 + $0x38] sm:$0xff]  ;;  %v168_v8 = vpack.c.bf16 %v44_v5, %v42_v3  ;;  %v46_v10 = vld [vmem:[#allocation5 + $0x20] sm:$0xff]  ;;  %v48_v11 = vld [vmem:[#allocation5 + $0x30] sm:$0xff]  ;;  %s151_s8 = sshll.u32 %s277_s1, 4  ;;  %s152_s8 = int_to_ptr.vmem [resolvable:$true] %s151_s8 }
  0x2a   :  { %v170_v9 = vpack.c.bf16 %v49_v7, %v47_v6  ;;  %v51_v12 = vld [vmem:[#allocation5 + $0x48] sm:$0xff]  ;;  %167 = vmatprep.subr.bf16.mxu0 %v166_v4  ;;  %182 = vmatprep.subr.bf16.mxu1 %v166_v4  ;;  %v53_v13 = vld [vmem:[#allocation5 + $0x58] sm:$0xff]  ;;  %v172_v14 = vpack.c.bf16 %v48_v11, %v46_v10  ;;  %v50_v16 = vld [vmem:[#allocation5 + $0x40] sm:$0xff]  ;;  %s242_s9 = scalar_lea.vmem %s152_s8, 512  ;;  %p247_p3 = scmp.lt.s32.totalorder %s152_s8, %s152_s8 }
  0x2b   :  { %169 = vmatpush1.bf16.msra.mxu0 %v168_v8  ;;  %186 = vmatpush1.bf16.msra.mxu1 %v168_v8  ;;  %v174_v15 = vpack.c.bf16 %v53_v13, %v51_v12  ;;  %v52_v17 = vld [vmem:[#allocation5 + $0x50] sm:$0xff]  ;;  %v55_v18 = vld [vmem:[#allocation5 + $0x68] sm:$0xff]  ;;  %v57_v19 = vld [vmem:[#allocation5 + $0x78] sm:$0xff]  ;;  %p243_p2 = scmp.ne.s32.totalorder %s152_s8, %s242_s9  ;;  %p248_p4 = scmp.lt.s32.totalorder %s242_s9, %s242_s9 }
  0x2c   :  { %171 = vmatprep.subr.bf16.mxu0 %v170_v9  ;;  %183 = vmatprep.subr.bf16.mxu1 %v170_v9  ;;  %v176_v20 = vpack.c.bf16 %v52_v17, %v50_v16  ;;  %v178_v21 = vpack.c.bf16 %v57_v19, %v55_v18  ;;  %v54_v22 = vld [vmem:[#allocation5 + $0x60] sm:$0xff]  ;;  %v56_v23 = vld [vmem:[#allocation5 + $0x70] sm:$0xff]  ;;  %v41_v26 = vld [vmem:[#allocation2 + $0x8] sm:$0xff] }
  0x2d   :  { %v180_v24 = vpack.c.bf16 %v56_v23, %v54_v22  ;;  %v40_v25 = vld [vmem:[#allocation2] sm:$0xff]  ;;  %p249_p5 = por %p248_p4, %p247_p3 }
  0x2f   :  { %173 = vmatpush1.bf16.msra.mxu0 %v172_v14  ;;  %187 = vmatpush1.bf16.msra.mxu1 %v172_v14  ;;  %p250_p6 = pnand %p249_p5, %p243_p2 }
  0x30   :  { %175 = vmatprep.subr.bf16.mxu0 %v174_v15  ;;  %184 = vmatprep.subr.bf16.mxu1 %v174_v15 }
  0x33   :  { %177 = vmatpush1.bf16.msra.mxu0 %v176_v20  ;;  %188 = vmatpush1.bf16.msra.mxu1 %v176_v20 }
  0x34   :  { %179 = vmatprep.subr.bf16.mxu0 %v178_v21  ;;  %185 = vmatprep.subr.bf16.mxu1 %v178_v21 }
  0x37   :  { %181 = vmatpush1.bf16.msra.mxu0 %v180_v24  ;;  %189 = vmatpush1.bf16.msra.mxu1 %v180_v24 }
  0x3a   :  { %164 = vmatmul.mubr.msk.f32.vlgmr.msra.gmra.mrb[0].mxu0 %vm58_vm0, %v40_v25  ;;  %165 = vmatmul.mubr.msk.f32.vlgmr.msra.gmra.mrb[0].mxu1 %vm58_vm0, %v41_v26 }
 0x10d   :  { %v131_v27 = vpop.f32.mrb[0].mxu0  ;;  %v137_v28 = vpop.f32.mrb[0].mxu1 }
 0x10e   :  { %142 = vst [vmem:[#allocation7] sm:$0xff] %v131_v27  ;;  %144 = vst [vmem:[#allocation7 + $0x10] sm:$0xff] %v137_v28  ;;  %v133_v29 = vpop.f32.mrb[1].mxu0  ;;  %v139_v30 = vpop.f32.mrb[1].mxu1 }
 0x10f   :  { %143 = vst [vmem:[#allocation7 + $0x8] sm:$0xff] %v133_v29  ;;  %145 = vst [vmem:[#allocation7 + $0x18] sm:$0xff] %v139_v30 }
 0x110   :  { %253 = shalt.err (!%p250_p6)
}
 0x111   :  { %s254_s12 = scalar_lea.hbm %s337_s2, 512 }
 0x112   :  { %p255_p7 = scmp.ne.s32.totalorder %s337_s2, %s254_s12  ;;  %p258_p8 = scmp.lt.u32.totalorder %s254_s12, %s337_s2 }
 0x114   :  { %p260_p9 = pnand %p258_p8, %p255_p7 }
 0x116   :  { %263 = shalt.err (!%p260_p9)
}
 0x117   :  { %157 = dma.vmem_to_hbm [thread:$0]  %s152_s8, 512, %s337_s2, [#allocation4], %s274_s0, %s274_s0, %s275_s5  }
 0x118   :  { %268 = dma.done.wait [#allocation4], 512  }
 0x119   :  { %269 = vsyncadd [#allocation4], 4294966784 }
 0x11a   :  { %161 = vsyncpa [#allocation3], 1 }
 0x11b   :  { %162 = vsyncpa [#allocation6], 1 }
 0x11c   :  { %163 = vsyncpa [#allocation4], 1 }

</bundles_post_ra>
